<compile_context>
chip_gen: v5e
topology: v5e:2x2
jax: 0.10.0
libtpu: 0.0.40
codegen_flags: <defaults>
</compile_context>

<pallas_src>
import jax
import jax.numpy as jnp
from jax import lax
from jax.experimental import pallas as pl
from jax.experimental.pallas import tpu as pltpu

LANE = 128


def _lovasz_kernel(gts_ref, err_ref, gt_ref, tlane_ref, lrow_ref, out_ref,
                   carry_ref, acc_ref):
    step = pl.program_id(0)
    R, L = err_ref.shape  # (tile_rows, 128), static

    @pl.when(step == 0)
    def _():
        carry_ref[...] = jnp.zeros_like(carry_ref)
        acc_ref[...] = jnp.zeros_like(acc_ref)

    gts = gts_ref[0, 0]          # total number of positive labels (f32 scalar)
    carry = carry_ref[0, 0]      # sum of gt in all previous tiles

    err = err_ref[...]                           # (R, 128) f32, sorted descending
    gt_bf = gt_ref[...]                          # (R, 128) bf16, 0/1
    gt = gt_bf.astype(jnp.float32)

    # Flattened (row-major) inclusive cumsum of gt within the tile:
    #   within-row cumsum via upper-triangular 128x128 matmul (MXU),
    #   plus exclusive prefix of row sums via strictly-lower-triangular RxR.
    c_lane = jnp.dot(gt_bf, tlane_ref[...],
                     preferred_element_type=jnp.float32)          # (R, 128)
    rs = jnp.sum(gt, axis=1, keepdims=True)                       # (R, 1)
    rs_b = jnp.broadcast_to(rs, (R, L)).astype(jnp.bfloat16)      # exact (<=128)
    prev_rows = jnp.dot(lrow_ref[...], rs_b,
                        preferred_element_type=jnp.float32)       # (R, 128)
    cum_gt = carry + prev_rows + c_lane                           # inclusive cumsum

    # Global 1-based position of each element in the sorted order.
    row_i = lax.broadcasted_iota(jnp.int32, (R, L), 0)
    col_i = lax.broadcasted_iota(jnp.int32, (R, L), 1)
    pos = (step * (R * L) + row_i * L + col_i + 1).astype(jnp.float32)

    # jaccard_i = 1 - (gts - cumsum_i) / (gts + (i+1) - cumsum_i)
    union = gts + (pos - cum_gt)                 # >= 1 for every real position
    jac = 1.0 - (gts - cum_gt) / union

    # jaccard_{i-1}, recomputed from (cumsum_i - gt_i, pos_i - 1).  The only
    # degenerate denominator is the very first global element when gts == 0,
    # where the Lovasz convention is jaccard_{-1} = 0.
    cg_prev = cum_gt - gt
    denom_prev = gts + (pos - 1.0) - cg_prev
    denom_safe = jnp.where(denom_prev == 0.0, 1.0, denom_prev)
    jac_prev = jnp.where(denom_prev == 0.0, 0.0,
                         1.0 - (gts - cg_prev) / denom_safe)

    grad = jac - jac_prev
    acc_ref[...] += jnp.maximum(err, 0.0) * grad

    carry_ref[...] += jnp.sum(rs)

    @pl.when(step == pl.num_programs(0) - 1)
    def _():
        out_ref[...] = jnp.zeros((1, 1), jnp.float32) + jnp.sum(acc_ref[...])


def lovasz_hinge_loss(logits, labels, tile_rows=512):
    """Binary Lovasz hinge loss.  logits: [N,1,H,W] (or [N,H,W]); labels: [N,H,W].

    tile_rows must be a multiple of 16 (bf16 sublane tiling of the gt stream).
    The effective tile height is clamped to the problem size so that small
    inputs are not padded to a full 512-row block.
    """
    assert tile_rows % 16 == 0, "tile_rows must be a multiple of 16"

    logits_f = logits.reshape(-1).astype(jnp.float32)
    labels_f = labels.reshape(-1).astype(jnp.float32)
    signs = 2.0 * labels_f - 1.0
    errors = 1.0 - logits_f * signs

    # TODO(synk): the data-dependent descending sort has no Pallas TPU
    # equivalent; it is done with jax.lax.sort here and only the post-sort
    # Lovasz reduction runs in the Pallas kernel.
    neg_sorted, gt_sorted = jax.lax.sort((-errors, labels_f), num_keys=1)
    errors_sorted = -neg_sorted
    gts = jnp.sum(labels_f).reshape(1, 1)

    n = errors_sorted.shape[0]

    # Clamp the tile height to what the input actually needs (rounded up to
    # the bf16 sublane multiple of 16) so tiny inputs don't pad to 64K elems.
    rows_needed = pl.cdiv(n, LANE)
    tile_rows = max(16, min(tile_rows, ((rows_needed + 15) // 16) * 16))

    block = tile_rows * LANE
    padded = pl.cdiv(n, block) * block
    pad = padded - n
    if pad:
        # relu(0) == 0 and gt == 0 -> the padded tail contributes nothing and
        # does not perturb the cumsum of the real (earlier) positions.
        errors_sorted = jnp.pad(errors_sorted, (0, pad), constant_values=0.0)
        gt_sorted = jnp.pad(gt_sorted, (0, pad), constant_values=0.0)

    rows = padded // LANE
    err2 = errors_sorted.reshape(rows, LANE)
    gt2 = gt_sorted.astype(jnp.bfloat16).reshape(rows, LANE)

    # Constant triangular matrices for the in-kernel cumsum (bf16 0/1, exact).
    li = jnp.arange(LANE, dtype=jnp.int32)
    t_lane = (li[:, None] <= li[None, :]).astype(jnp.bfloat16)      # (128,128)
    ri = jnp.arange(tile_rows, dtype=jnp.int32)
    l_row = (ri[None, :] < ri[:, None]).astype(jnp.bfloat16)        # (R,R)

    grid = (rows // tile_rows,)

    out = pl.pallas_call(
        _lovasz_kernel,
        out_shape=jax.ShapeDtypeStruct((1, 1), jnp.float32),
        grid_spec=pltpu.PrefetchScalarGridSpec(
            num_scalar_prefetch=0,
            grid=grid,
            in_specs=[
                pl.BlockSpec((1, 1), lambda i: (0, 0)),                     # gts
                pl.BlockSpec((tile_rows, LANE), lambda i: (i, 0)),          # errors
                pl.BlockSpec((tile_rows, LANE), lambda i: (i, 0)),          # gt (bf16)
                pl.BlockSpec((LANE, LANE), lambda i: (0, 0)),               # T_lane
                pl.BlockSpec((tile_rows, tile_rows), lambda i: (0, 0)),     # L_row
            ],
            out_specs=pl.BlockSpec((1, 1), lambda i: (0, 0)),
            scratch_shapes=[
                pltpu.VMEM((1, 1), jnp.float32),              # cumsum carry
                pltpu.VMEM((tile_rows, LANE), jnp.float32),   # loss accumulator
            ],
        ),
        compiler_params=pltpu.CompilerParams(
            # Sequential carry across tiles -> the grid axis must be arbitrary.
            dimension_semantics=("arbitrary",),
        ),
    )(gts, err2, gt2, t_lane, l_row)
    return out[0, 0]


def _reference(logits, labels):
    """Pure-JAX mirror of the PyTorch BinaryLovaszHingeLoss forward."""
    lg = logits.reshape(-1).astype(jnp.float32)
    lb = labels.reshape(-1).astype(jnp.float32)
    signs = 2.0 * lb - 1.0
    errors = 1.0 - lg * signs
    order = jnp.argsort(-errors)
    errors_sorted = errors[order]
    gt_sorted = lb[order]
    gts = jnp.sum(gt_sorted)
    intersection = gts - jnp.cumsum(gt_sorted)
    union = gts + jnp.cumsum(1.0 - gt_sorted)
    jaccard = 1.0 - intersection / union
    grad = jnp.concatenate([jaccard[:1], jaccard[1:] - jaccard[:-1]])
    return jnp.dot(jnp.maximum(errors_sorted, 0.0), grad)


if __name__ == "__main__":
    key = jax.random.PRNGKey(0)
    k1, k2 = jax.random.split(key)

    # [N, 1, H, W] logits, [N, H, W] binary masks (as in the module's forward).
    logits = jax.random.normal(k1, (8, 1, 32, 32), dtype=jnp.float32)
    labels = (jax.random.uniform(k2, (8, 32, 32)) > 0.5).astype(jnp.float32)

    # Multi-tile path (exercises the cross-tile cumsum carry) and the default
    # adaptive-tile path (single big tile for this size).
    loss_multi = lovasz_hinge_loss(logits, labels, tile_rows=16)
    loss_single = lovasz_hinge_loss(logits, labels)
    # Degenerate case: no positive labels (gts == 0) exercises the jac_prev guard.
    labels_zero = jnp.zeros_like(labels)
    loss_zero = lovasz_hinge_loss(logits, labels_zero)
    jax.block_until_ready((loss_multi, loss_single, loss_zero))

    ref = _reference(logits, labels)
    ref_zero = _reference(logits, labels_zero)
    assert jnp.allclose(loss_multi, ref, atol=3e-5, rtol=3e-5), (loss_multi, ref)
    assert jnp.allclose(loss_single, ref, atol=3e-5, rtol=3e-5), (loss_single, ref)
    assert jnp.allclose(loss_zero, ref_zero, atol=3e-5, rtol=3e-5), (loss_zero, ref_zero)
    print("KERNEL_OK")
</pallas_src>

<mosaic_0001>
module attributes {stable_mosaic.version = 11 : i64} {
  func.func @_lovasz_kernel(%arg0: i32, %arg1: memref<1x1xf32, #tpu.memory_space<vmem>>, %arg2: memref<16x128xf32, #tpu.memory_space<vmem>>, %arg3: memref<16x128xbf16, #tpu.memory_space<vmem>>, %arg4: memref<128x128xbf16, #tpu.memory_space<vmem>>, %arg5: memref<16x16xbf16, #tpu.memory_space<vmem>>, %arg6: memref<1x1xf32, #tpu.memory_space<vmem>>, %arg7: memref<1x1xf32, #tpu.memory_space<vmem>>, %arg8: memref<16x128xf32, #tpu.memory_space<vmem>>) attributes {dimension_semantics = [#tpu.dimension_semantics<arbitrary>], iteration_bounds = array<i64: 4>, scalar_prefetch = 0 : i64, scratch_operands = 2 : i64, tpu.core_type = #tpu.core_type<tc>, window_params = [{pipeline_mode = #tpu.pipeline_mode<synchronous>, transform_indices = @transform_0, window_bounds = array<i64: 1, 1>}, {transform_indices = @transform_1, window_bounds = array<i64: 16, 128>}, {transform_indices = @transform_2, window_bounds = array<i64: 16, 128>}, {pipeline_mode = #tpu.pipeline_mode<synchronous>, transform_indices = @transform_3, window_bounds = array<i64: 128, 128>}, {pipeline_mode = #tpu.pipeline_mode<synchronous>, transform_indices = @transform_4, window_bounds = array<i64: 16, 16>}, {pipeline_mode = #tpu.pipeline_mode<synchronous>, transform_indices = @transform_5, window_bounds = array<i64: 1, 1>}]} {
    %c0_i32 = arith.constant 0 : i32
    %0 = arith.cmpi eq, %arg0, %c0_i32 : i32
    %1 = arith.extui %0 : i1 to i32
    %c0_i32_0 = arith.constant 0 : i32
    %2 = arith.cmpi ne, %1, %c0_i32_0 : i32
    scf.if %2 {
      %cst_32 = arith.constant 0.000000e+00 : f32
      %78 = vector.broadcast %cst_32 : f32 to vector<1x1xf32>
      %c0_33 = arith.constant 0 : index
      %c0_34 = arith.constant 0 : index
      %79 = vector.load %arg7[%c0_33, %c0_34] : memref<1x1xf32, #tpu.memory_space<vmem>>, vector<1x1xf32>
      tpu.vector_store %arg7[%c0_33, %c0_34], %78 {strides = array<i32>} : memref<1x1xf32, #tpu.memory_space<vmem>>, vector<1x1xf32>,
      %cst_35 = arith.constant 0.000000e+00 : f32
      %80 = vector.broadcast %cst_35 : f32 to vector<16x128xf32>
      %c0_36 = arith.constant 0 : index
      %c0_37 = arith.constant 0 : index
      %81 = vector.load %arg8[%c0_36, %c0_37] : memref<16x128xf32, #tpu.memory_space<vmem>>, vector<16x128xf32>
      tpu.vector_store %arg8[%c0_36, %c0_37], %80 {strides = array<i32>} : memref<16x128xf32, #tpu.memory_space<vmem>>, vector<16x128xf32>,
    } else {
    }
    %c0 = arith.constant 0 : index
    %c0_1 = arith.constant 0 : index
    %3 = vector.load %arg1[%c0, %c0_1] : memref<1x1xf32, #tpu.memory_space<vmem>>, vector<1x1xf32>
    %4 = vector.extract %3[0, 0] : f32 from vector<1x1xf32>
    %c0_2 = arith.constant 0 : index
    %c0_3 = arith.constant 0 : index
    %5 = vector.load %arg7[%c0_2, %c0_3] : memref<1x1xf32, #tpu.memory_space<vmem>>, vector<1x1xf32>
    %6 = vector.extract %5[0, 0] : f32 from vector<1x1xf32>
    %c0_4 = arith.constant 0 : index
    %c0_5 = arith.constant 0 : index
    %7 = vector.load %arg2[%c0_4, %c0_5] : memref<16x128xf32, #tpu.memory_space<vmem>>, vector<16x128xf32>
    %c0_6 = arith.constant 0 : index
    %c0_7 = arith.constant 0 : index
    %8 = vector.load %arg3[%c0_6, %c0_7] : memref<16x128xbf16, #tpu.memory_space<vmem>>, vector<16x128xbf16>
    %9 = arith.extf %8 : vector<16x128xbf16> to vector<16x128xf32>
    %c0_8 = arith.constant 0 : index
    %c0_9 = arith.constant 0 : index
    %10 = vector.load %arg4[%c0_8, %c0_9] : memref<128x128xbf16, #tpu.memory_space<vmem>>, vector<128x128xbf16>
    %cst = arith.constant dense<0.000000e+00> : vector<16x128xf32>
    %11 = tpu.matmul %8, %10, %cst {dimension_numbers = #tpu.dot_dimension_numbers<[1], [0], [0], [1], [0, 0, 1, 1], [], []>} : vector<16x128xbf16>, vector<128x128xbf16>, vector<16x128xf32> -> vector<16x128xf32>
    %cst_10 = arith.constant dense<0.000000e+00> : vector<16xf32>
    %12 = vector.multi_reduction <add>, %9, %cst_10 [1] : vector<16x128xf32> to vector<16xf32>
    %13 = vector.shape_cast %12 : vector<16xf32> to vector<16x1xf32>
    %14 = vector.shape_cast %13 : vector<16x1xf32> to vector<16x1xf32>
    %15 = vector.broadcast %14 : vector<16x1xf32> to vector<16x128xf32>
    %16 = arith.truncf %15 : vector<16x128xf32> to vector<16x128xbf16>
    %c0_11 = arith.constant 0 : index
    %c0_12 = arith.constant 0 : index
    %17 = vector.load %arg5[%c0_11, %c0_12] : memref<16x16xbf16, #tpu.memory_space<vmem>>, vector<16x16xbf16>
    %cst_13 = arith.constant dense<0.000000e+00> : vector<16x128xf32>
    %18 = tpu.matmul %17, %16, %cst_13 {dimension_numbers = #tpu.dot_dimension_numbers<[1], [0], [0], [1], [0, 0, 1, 1], [], []>} : vector<16x16xbf16>, vector<16x128xbf16>, vector<16x128xf32> -> vector<16x128xf32>
    %19 = vector.broadcast %6 : f32 to vector<16x128xf32>
    %20 = arith.addf %19, %18 : vector<16x128xf32>
    %21 = arith.addf %20, %11 : vector<16x128xf32>
    %22 = tpu.iota {dimensions = array<i32: 0>} : vector<16x128xi32>
    %23 = tpu.iota {dimensions = array<i32: 1>} : vector<16x128xi32>
    %c2048_i32 = arith.constant 2048 : i32
    %24 = arith.muli %arg0, %c2048_i32 : i32
    %c128_i32 = arith.constant 128 : i32
    %25 = vector.broadcast %c128_i32 : i32 to vector<16x128xi32>
    %26 = arith.muli %22, %25 : vector<16x128xi32>
    %27 = vector.broadcast %24 : i32 to vector<16x128xi32>
    %28 = arith.addi %27, %26 : vector<16x128xi32>
    %29 = arith.addi %28, %23 : vector<16x128xi32>
    %c1_i32 = arith.constant 1 : i32
    %30 = vector.broadcast %c1_i32 : i32 to vector<16x128xi32>
    %31 = arith.addi %29, %30 : vector<16x128xi32>
    %32 = arith.sitofp %31 : vector<16x128xi32> to vector<16x128xf32>
    %33 = arith.subf %32, %21 : vector<16x128xf32>
    %34 = vector.broadcast %4 : f32 to vector<16x128xf32>
    %35 = arith.addf %34, %33 : vector<16x128xf32>
    %36 = vector.broadcast %4 : f32 to vector<16x128xf32>
    %37 = arith.subf %36, %21 : vector<16x128xf32>
    %38 = arith.divf %37, %35 : vector<16x128xf32>
    %cst_14 = arith.constant 1.000000e+00 : f32
    %39 = vector.broadcast %cst_14 : f32 to vector<16x128xf32>
    %40 = arith.subf %39, %38 : vector<16x128xf32>
    %41 = arith.subf %21, %9 : vector<16x128xf32>
    %cst_15 = arith.constant 1.000000e+00 : f32
    %42 = vector.broadcast %cst_15 : f32 to vector<16x128xf32>
    %43 = arith.subf %32, %42 : vector<16x128xf32>
    %44 = vector.broadcast %4 : f32 to vector<16x128xf32>
    %45 = arith.addf %44, %43 : vector<16x128xf32>
    %46 = arith.subf %45, %41 : vector<16x128xf32>
    %cst_16 = arith.constant 0.000000e+00 : f32
    %47 = vector.broadcast %cst_16 : f32 to vector<16x128xf32>
    %48 = arith.cmpf oeq, %46, %47 : vector<16x128xf32>
    %cst_17 = arith.constant 1.000000e+00 : f32
    %49 = vector.broadcast %cst_17 : f32 to vector<16x128xf32>
    %50 = arith.select %48, %49, %46 : vector<16x128xi1>, vector<16x128xf32>
    %cst_18 = arith.constant 0.000000e+00 : f32
    %51 = vector.broadcast %cst_18 : f32 to vector<16x128xf32>
    %52 = arith.cmpf oeq, %46, %51 : vector<16x128xf32>
    %53 = vector.broadcast %4 : f32 to vector<16x128xf32>
    %54 = arith.subf %53, %41 : vector<16x128xf32>
    %55 = arith.divf %54, %50 : vector<16x128xf32>
    %cst_19 = arith.constant 1.000000e+00 : f32
    %56 = vector.broadcast %cst_19 : f32 to vector<16x128xf32>
    %57 = arith.subf %56, %55 : vector<16x128xf32>
    %cst_20 = arith.constant 0.000000e+00 : f32
    %58 = vector.broadcast %cst_20 : f32 to vector<16x128xf32>
    %59 = arith.select %52, %58, %57 : vector<16x128xi1>, vector<16x128xf32>
    %60 = arith.subf %40, %59 : vector<16x128xf32>
    %c0_21 = arith.constant 0 : index
    %c0_22 = arith.constant 0 : index
    %61 = vector.load %arg8[%c0_21, %c0_22] : memref<16x128xf32, #tpu.memory_space<vmem>>, vector<16x128xf32>
    %cst_23 = arith.constant 0.000000e+00 : f32
    %62 = vector.broadcast %cst_23 : f32 to vector<16x128xf32>
    %63 = arith.maximumf %7, %62 : vector<16x128xf32>
    %64 = arith.mulf %63, %60 : vector<16x128xf32>
    %65 = arith.addf %61, %64 : vector<16x128xf32>
    %c0_24 = arith.constant 0 : index
    %c0_25 = arith.constant 0 : index
    %66 = vector.load %arg8[%c0_24, %c0_25] : memref<16x128xf32, #tpu.memory_space<vmem>>, vector<16x128xf32>
    tpu.vector_store %arg8[%c0_24, %c0_25], %65 {strides = array<i32>} : memref<16x128xf32, #tpu.memory_space<vmem>>, vector<16x128xf32>,
    %c0_26 = arith.constant 0 : index
    %c0_27 = arith.constant 0 : index
    %67 = vector.load %arg7[%c0_26, %c0_27] : memref<1x1xf32, #tpu.memory_space<vmem>>, vector<1x1xf32>
    %68 = vector.shape_cast %13 : vector<16x1xf32> to vector<1x16x1xf32>
    %cst_28 = arith.constant dense<0.000000e+00> : vector<1xf32>
    %69 = vector.multi_reduction <add>, %68, %cst_28 [1, 2] : vector<1x16x1xf32> to vector<1xf32>
    %70 = vector.shape_cast %69 : vector<1xf32> to vector<1x1x1xf32>
    %71 = vector.extract %70[0, 0, 0] : f32 from vector<1x1x1xf32>
    %72 = vector.broadcast %71 : f32 to vector<1x1xf32>
    %73 = arith.addf %67, %72 : vector<1x1xf32>
    %c0_29 = arith.constant 0 : index
    %c0_30 = arith.constant 0 : index
    %74 = vector.load %arg7[%c0_29, %c0_30] : memref<1x1xf32, #tpu.memory_space<vmem>>, vector<1x1xf32>
    tpu.vector_store %arg7[%c0_29, %c0_30], %73 {strides = array<i32>} : memref<1x1xf32, #tpu.memory_space<vmem>>, vector<1x1xf32>,
    %c3_i32 = arith.constant 3 : i32
    %75 = arith.cmpi eq, %arg0, %c3_i32 : i32
    %76 = arith.extui %75 : i1 to i32
    %c0_i32_31 = arith.constant 0 : i32
    %77 = arith.cmpi ne, %76, %c0_i32_31 : i32
    scf.if %77 {
      %cst_32 = arith.constant 0.000000e+00 : f32
      %78 = vector.broadcast %cst_32 : f32 to vector<1x1xf32>
      %c0_33 = arith.constant 0 : index
      %c0_34 = arith.constant 0 : index
      %79 = vector.load %arg8[%c0_33, %c0_34] : memref<16x128xf32, #tpu.memory_space<vmem>>, vector<16x128xf32>
      %80 = vector.shape_cast %79 : vector<16x128xf32> to vector<1x16x128xf32>
      %cst_35 = arith.constant dense<0.000000e+00> : vector<1xf32>
      %81 = vector.multi_reduction <add>, %80, %cst_35 [1, 2] : vector<1x16x128xf32> to vector<1xf32>
      %82 = vector.shape_cast %81 : vector<1xf32> to vector<1x1x1xf32>
      %83 = vector.extract %82[0, 0, 0] : f32 from vector<1x1x1xf32>
      %84 = vector.broadcast %83 : f32 to vector<1x1xf32>
      %85 = arith.addf %78, %84 : vector<1x1xf32>
      %c0_36 = arith.constant 0 : index
      %c0_37 = arith.constant 0 : index
      %86 = vector.load %arg6[%c0_36, %c0_37] : memref<1x1xf32, #tpu.memory_space<vmem>>, vector<1x1xf32>
      tpu.vector_store %arg6[%c0_36, %c0_37], %85 {strides = array<i32>} : memref<1x1xf32, #tpu.memory_space<vmem>>, vector<1x1xf32>,
    } else {
    }
    return
  }
  func.func @transform_0(%arg0: i32) -> (i32, i32) {
    %c0_i32 = arith.constant 0 : i32
    %c0_i32_0 = arith.constant 0 : i32
    %c0_i32_1 = arith.constant 0 : i32
    return %c0_i32, %c0_i32_0 : i32, i32
  }
  func.func @transform_1(%arg0: i32) -> (i32, i32) {
    %c0_i32 = arith.constant 0 : i32
    %c0_i32_0 = arith.constant 0 : i32
    return %arg0, %c0_i32 : i32, i32
  }
  func.func @transform_2(%arg0: i32) -> (i32, i32) {
    %c0_i32 = arith.constant 0 : i32
    %c0_i32_0 = arith.constant 0 : i32
    return %arg0, %c0_i32 : i32, i32
  }
  func.func @transform_3(%arg0: i32) -> (i32, i32) {
    %c0_i32 = arith.constant 0 : i32
    %c0_i32_0 = arith.constant 0 : i32
    %c0_i32_1 = arith.constant 0 : i32
    return %c0_i32, %c0_i32_0 : i32, i32
  }
  func.func @transform_4(%arg0: i32) -> (i32, i32) {
    %c0_i32 = arith.constant 0 : i32
    %c0_i32_0 = arith.constant 0 : i32
    %c0_i32_1 = arith.constant 0 : i32
    return %c0_i32, %c0_i32_0 : i32, i32
  }
  func.func @transform_5(%arg0: i32) -> (i32, i32) {
    %c0_i32 = arith.constant 0 : i32
    %c0_i32_0 = arith.constant 0 : i32
    %c0_i32_1 = arith.constant 0 : i32
    return %c0_i32, %c0_i32_0 : i32, i32
  }
}

</mosaic_0001>

<bundles_post_ra>
// kernel: tpu_custom_call.1
= control target key start
LH: loop header
LB: loop body
LE: loop exit
PB: predicated region body
PF: predicated region fallthrough
CT: control target
= control target key end

     0   :  { %s1325_s0 = inlined_call_operand.<no memory space> [shape: f32[1,1], index: 0, kind: input, shape index: {}]   ;;  %s1326_s1 = inlined_call_operand.hbm [shape: f32[64,128], index: 1, kind: input, shape index: {}]   ;;  %s1327_s2 = inlined_call_operand.hbm [shape: bf16[64,128], index: 2, kind: input, shape index: {}]   ;;  %s1328_s3 = inlined_call_operand.hbm [shape: bf16[128,128], index: 3, kind: input, shape index: {}]   ;;  %s1329_s4 = inlined_call_operand.hbm [shape: bf16[16,16], index: 4, kind: input, shape index: {}]   ;;  %s1330_s5 = inlined_call_operand.hbm [shape: f32[1,1], index: 5, kind: output, shape index: {}]  }
   0x1   :  { %1333 = sst [smem:[#allocation19_spill]] %s1326_s1  ;;  %v10_v0 = vstv %s1325_s0 }
   0x2   :  { %11 = vst [vmem:[#allocation4] sm:$0x1] %v10_v0 }
   0x3   :  { %12 = vsyncpa [#allocation6], 0 }
   0x4   :  { %14 = vsyncpa [#allocation6 + $0x1], 0 }
   0x5   :  { %15 = vsyncpa [#allocation9], 0 }
   0x6   :  { %17 = vsyncpa [#allocation9 + $0x1], 0 }
   0x7   :  { %18 = vsyncpa [#allocation12], 0 }
   0x8   :  { %19 = vsyncpa [#allocation7], 0  ;;  %s1116_s20 = smov 0   ;;  %s1118_s21 = smov 0  }
   0x9   :  { %s1120_s22 = smov 0   ;;  %s1122_s23 = smov 0  }
   0xa LB: > { %s1135_s0 = sadd.s32 4294967295, %s1073_s23   ;;  %p66_p0 = scmp.ne.s32.totalorder %s1065_s21, %s1061_s20  ;;  %s1073_s23 = sphi %s1122_s23, %s1343_s23   ;;  %s1069_s22 = sphi %s1120_s22, %s1342_s22   ;;  %s1065_s21 = sphi %s1118_s21, %s1341_s21   ;;  %s1061_s20 = sphi %s1116_s20, %s1340_s20  }
   0xb   : > { %p67_p1 = scmp.eq.s32.totalorder %s1135_s0, 0  ;;  %p705_p2 = scmp.ge.s32.totalorder %s1073_s23, 1 }
   0xc   : > { %p166_p3 = scmp.lt.s32.totalorder %s1073_s23, 5  ;;  %p706_p4 = scmp.ne.s32.totalorder %s1135_s0, 0 }
   0xd   : > { %p1144_p5 = por %p67_p1, %p66_p0  ;;  %s180_s27 = sshll.u32 %s1328_s3, 4  ;;  %s181_s27 = int_to_ptr.hbm [resolvable:$true] %s180_s27 }
   0xe   : > { %p1151_p6 = pnand %p705_p2, %p166_p3  ;;  %s1075_s29 = smov [#allocation10]  }
   0xf   : > { %s182_s30 = sshll.u32 %s1075_s29, 4  ;;  %s194_s8 = sshll.u32 %s1329_s4, 4  ;;  %s183_s30 = int_to_ptr.vmem [resolvable:$true] %s182_s30  ;;  %s195_s8 = int_to_ptr.hbm [resolvable:$true] %s194_s8 }
  0x10   : > { %p806_p7 = pneg %p1151_p6  ;;  %s1331_s9 = smov 64  }
  0x11   : > { %s1332_s10 = smov 4   ;;  %s1078_s11 = smov [#allocation11]  }
  0x12   : > { %p807_p8 = pnand %p806_p7, %p67_p1  ;;  %s196_s12 = sshll.u32 %s1078_s11, 4  ;;  %s197_s12 = int_to_ptr.vmem [resolvable:$true] %s196_s12 }
  0x13   : > { %s1169_s13 = sadd.s32 1, %s1073_s23   ;;  %s53_s14 = sadd.s32 1, %s1069_s22 }
  0x14   : > { %809 = dma.hbm_to_vmem [thread:$0]  (!%p807_p8), %s181_s27, 1024, %s183_s30, [#allocation9], %s1331_s9, %s1331_s9, %s1332_s10  }
  0x15   : > { %812 = dma.hbm_to_vmem [thread:$0]  (!%p807_p8), %s195_s8, 128, %s197_s12, [#allocation12], %s1331_s9, %s1331_s9, %s1332_s10  }
  0x16   : > { %s50_s15 = ssub.s32 %s1073_s23, %s1169_s13  ;;  %p60_p9 = scmp.ne.s32.totalorder %s1069_s22, %s1065_s21 }
  0x17   : > { %p51_p10 = scmp.eq.s32.totalorder %s50_s15, 0  ;;  %p61_p11 = scmp.eq.s32.totalorder %s1073_s23, 0 }
  0x18   : > { %p822_p12 = scmp.lt.s32.totalorder %s1073_s23, 4  ;;  %s1179_s16 = sand.u32 1, %s1069_s22  }
  0x19   : > { %s1182_s17 = scalar_select %p51_p10, %s1069_s22, %s53_s14  }
  0x1a   : > { %p62_p13 = por %p61_p11, %p60_p9  ;;  %s709_s18 = sshll.u32 %s1179_s16, 4 }
  0x1b   : > { %s770_s19 = sshll.u32 %s1073_s23, 4  ;;  %s1336_s1 = sld [smem:[#allocation19_spill]] }
  0x1c   : > { %s214_s29 = scalar_lea.vmem [#allocation5], %s709_s18  ;;  %p1189_p0 = pnand %p822_p12, %p62_p13 }
  0x1d   : > { %s222_s30 = sshll.u32 %s214_s29, 4  ;;  %s232_s7 = sand.u32 1, %s1073_s23   ;;  %s223_s30 = int_to_ptr.vmem [resolvable:$true] %s222_s30 }
  0x1e   : > { %s211_s8 = scalar_lea.sflag [#allocation6], %s1179_s16  ;;  %p939_p3 = pneg %p1189_p0 }
  0x21   : > { %s219_s26 = scalar_lea.hbm %s1336_s1, %s770_s19  ;;  %s942_s18 = scalar_lea.hbm %s1336_s1, 64 }
  0x22   : > { %s220_s27 = sshll.u32 %s219_s26, 4  ;;  %s221_s27 = int_to_ptr.hbm [resolvable:$true] %s220_s27 }
  0x23   : > { %s935_s11 = sshra.s32 %s221_s27, 4  ;;  %s936_s11 = int_to_ptr.hbm [resolvable:$true] %s935_s11 }
  0x24   : > { %s937_s12 = scalar_lea.hbm %s936_s11, 16  ;;  %p943_p9 = scmp.lt.s32.totalorder %s936_s11, %s1336_s1 }
  0x25   : > { %p938_p2 = scmp.ne.s32.totalorder %s936_s11, %s937_s12  ;;  %p944_p10 = scmp.lt.s32.totalorder %s942_s18, %s937_s12 }
  0x27   : > { %p940_p7 = pnand %p939_p3, %p938_p2  ;;  %p945_p11 = por %p944_p10, %p943_p9 }
  0x29   : > { %p941_p8 = pneg %p940_p7 }
  0x2b   : > { %p946_p12 = pnand %p945_p11, %p941_p8 }
  0x2d   : > { %949 = shalt.err (!%p946_p12)
}
  0x2e   : > { %s1079_s25 = smov 128   ;;  %s1080_s26 = smov 8  }
  0x2f   : > { %816 = dma.hbm_to_vmem [thread:$0]  (!%p1189_p0), %s221_s27, 256, %s223_s30, %s211_s8, %s1079_s25, %s1079_s25, %s1080_s26  }
  0x30   : > { %s712_s29 = sshll.u32 %s1179_s16, 3  ;;  %s771_s9 = sshll.u32 %s1073_s23, 3 }
  0x31   : > { %s241_s10 = scalar_lea.hbm %s1327_s2, %s771_s9  ;;  %s236_s11 = scalar_lea.vmem [#allocation8], %s712_s29 }
  0x32   : > { %s242_s19 = sshll.u32 %s241_s10, 4  ;;  %s244_s12 = sshll.u32 %s236_s11, 4  ;;  %s243_s19 = int_to_ptr.hbm [resolvable:$true] %s242_s19  ;;  %s245_s12 = int_to_ptr.vmem [resolvable:$true] %s244_s12 }
  0x33   : > { %s233_s18 = scalar_lea.sflag [#allocation9], %s232_s7  ;;  %s965_s20 = sshra.s32 %s243_s19, 4  ;;  %s966_s20 = int_to_ptr.hbm [resolvable:$true] %s965_s20 }
  0x34   : > { %s967_s1 = scalar_lea.hbm %s966_s20, 8  ;;  %s972_s27 = scalar_lea.hbm %s1327_s2, 32 }
  0x35   : > { %p968_p13 = scmp.ne.s32.totalorder %s966_s20, %s967_s1  ;;  %p973_p8 = scmp.lt.s32.totalorder %s966_s20, %s1327_s2 }
  0x36   : > { %p974_p9 = scmp.lt.s32.totalorder %s972_s27, %s967_s1 }
  0x37   : > { %p970_p2 = pnand %p968_p13, %p939_p3 }
  0x38   : > { %p975_p10 = por %p974_p9, %p973_p8 }
  0x39   : > { %p971_p7 = pneg %p970_p2 }
  0x3b   : > { %p976_p11 = pnand %p975_p10, %p971_p7 }
  0x3d   : > { %979 = shalt.err (!%p976_p11)
}
  0x3e   : > { %s1338_s10 = smov 4   ;;  %s1339_s7 = smov 64  }
  0x3f   : > { %819 = dma.hbm_to_vmem [thread:$0]  (!%p1189_p0), %s243_s19, 128, %s245_s12, %s233_s18, %s1339_s7, %s1339_s7, %s1338_s10  }
  0x40   : > { %256 = sbr.rel (%p1151_p6) target bundleno = 586 (0x24a), region = 40  ;;  %s258_s8 = sand.u32 (!%p1151_p6), 1, %s1065_s21  }
  0x41   : > { %s716_s25 = sshll.u32 (!%p1151_p6), %s258_s8, 4  ;;  %s259_s26 = scalar_lea.sflag (!%p1151_p6), [#allocation6], %s258_s8 }
  0x42   : > { %s1230_s29 = scalar_lea.vmem (!%p1151_p6), [#allocation5], %s716_s25 }
  0x45   : > { %1040 = dma.done.wait (%p1144_p5), %s259_s26, 256  }
  0x46   : > { %1042 = vsyncadd (%p1144_p5), %s259_s26, 4294967040  ;;  %s268_s1 = sand.u32 1, %s1135_s0   ;;  %s717_s6 = sshll.u32 %s258_s8, 3 }
  0x47   : > { %s269_s14 = scalar_lea.sflag [#allocation9], %s268_s1  ;;  %s1237_s15 = scalar_lea.vmem [#allocation8], %s717_s6 }
  0x48   : > { %1044 = dma.done.wait (%p1144_p5), %s269_s14, 128  }
  0x49   : > { %1046 = vsyncadd (%p1144_p5), %s269_s14, 4294967168 }
  0x4a   : > { %1048 = dma.done.wait (%p67_p1), [#allocation9], 1024  }
  0x4b   : > { %1050 = vsyncadd (%p67_p1), [#allocation9], 4294966272 }
  0x4c   : > { %1052 = dma.done.wait (%p67_p1), [#allocation12], 128  }
  0x4d   : > { %1054 = vsyncadd (%p67_p1), [#allocation12], 4294967168  ;;  %316 = sbr.rel (%p706_p4) target bundleno = 86 (0x56), region = 60 }
  0x52   : > { %vm317_vm0 = vcmask 0   ;;  %v1081_v1 = vmov 0.0  }
  0x53   : > { %318 = vst.msk [vmem:[#allocation2] sm:$0x1] %vm317_vm0, %v1081_v1 }
  0x54   : > { %319 = vst [vmem:[#allocation3] sm:$0xff] %v1081_v1 }
  0x55   : > { %320 = vst [vmem:[#allocation3 + $0x8] sm:$0xff] %v1081_v1 }
  0x56 PF: > { %v1254_v2 = vld [vmem:[%s1237_s15] sm:$0xff]   ;;  %v778_v6 = vld [vmem:[#allocation10 + $0x28] sm:$0xff]  ;;  %v777_v8 = vld [vmem:[#allocation10 + $0x20] sm:$0xff]  ;;  %vm567_vm1 = vcmask 7168   ;;  %vm427_vm2 = vcmask 130048   ;;  %v450_v23 = vlaneseq  ;;  %s762_s24 = sshll.u32 %s1135_s0, 11 }
  0x57   : > { %v780_v3 = vld [vmem:[#allocation10 + $0x38] sm:$0xff]  ;;  %v329_v4 = vunpack.c.l.bf16 %v1254_v2  ;;  %v779_v5 = vld [vmem:[#allocation10 + $0x30] sm:$0xff]  ;;  %v330_v7 = vunpack.c.h.bf16 %v1254_v2  ;;  %v774_v11 = vld [vmem:[#allocation10 + $0x8] sm:$0xff]  ;;  %v458_v26 = vstv %s762_s24  ;;  %p765_p1 = scmp.ne.s32.totalorder %s1135_s0, 3 }
  0x58   : > { %401 = vmatpush.bf16.msra.mxu0 %v780_v3  ;;  %v776_v9 = vld [vmem:[#allocation10 + $0x18] sm:$0xff]  ;;  %v775_v10 = vld [vmem:[#allocation10 + $0x10] sm:$0xff]  ;;  %v773_v12 = vld [vmem:[#allocation10] sm:$0xff]  ;;  %v451_v24 = vshrl.u32 %v450_v23, 7  ;;  %v454_v27 = vand.u32 127, %v450_v23 }
  0x59   : > { %415 = vadd.xlane.f32.xlu0 %v329_v4  ;;  %v772_v13 = vld [vmem:[%s1237_s15] sm:$0xff]  ;;  %v321_v14 = vld [vmem:[#allocation4] sm:$0x1]  ;;  %v781_v22 = vld [vmem:[#allocation11] sm:$0xff] }
  0x5a   : > { %v323_v15 = vld [vmem:[#allocation2] sm:$0x1]  ;;  %782 = vpush %v321_v14  ;;  %v456_v25 = vmul.u32 128, %v451_v24  ;;  %v452_v29 = vadd.s32 8, %v451_v24 }
  0x5b   : > { %784 = vpush %v323_v15 }
  0x5c   : > { %402 = vmatpush.bf16.msra.mxu0 %v779_v5  ;;  %v459_v28 = vadd.s32 %v458_v26, %v456_v25  ;;  %v457_v33 = vmul.u32 128, %v452_v29  ;;  %v325_v29 = vld [vmem:[%s1230_s29] sm:$0xff] }
  0x5e   : > { %v461_v30 = vadd.s32 %v459_v28, %v454_v27  ;;  %v460_v37 = vadd.s32 %v458_v26, %v457_v33 }
  0x60   : > { %403 = vmatpush.bf16.msra.mxu0 %v778_v6  ;;  %v463_v35 = vadd.s32 1, %v461_v30  ;;  %v462_v41 = vadd.s32 %v460_v37, %v454_v27 }
  0x61   : > { %417 = vadd.xlane.f32.xlu0 %v330_v7 }
  0x62   : > { %v465_v39 = vcvt.s32.f32 %v463_v35  ;;  %v464_v49 = vadd.s32 1, %v462_v41 }
  0x64   : > { %404 = vmatpush.bf16.msra.mxu0 %v777_v8  ;;  %v763_v43 = vadd.f32 -1.0, %v465_v39  ;;  %v466_v54 = vcvt.s32.f32 %v464_v49 }
  0x66   : > { %v764_v58 = vadd.f32 -1.0, %v466_v54 }
  0x68   : > { %405 = vmatpush.bf16.msra.mxu0 %v776_v9 }
  0x6c   : > { %406 = vmatpush.bf16.msra.mxu0 %v775_v10 }
  0x70   : > { %407 = vmatpush.bf16.msra.mxu0 %v774_v11 }
  0x74   : > { %408 = vmatpush.bf16.msra.mxu0 %v773_v12 }
  0x77   : > { %409 = vmatmul.bf16.vlgmr.msra.gmra.mxu0 %v772_v13 }
  0x8b   : > { %s783_s28 = spop %782 }
  0x8c   : > { %s785_s19 = spop %784  ;;  %v1264_v45 = vstv %s783_s28 }
  0x8d   : > { %v445_v42 = vstv %s785_s19  ;;  %v510_v51 = vadd.f32 %v763_v43, %v1264_v45  ;;  %v511_v63 = vadd.f32 %v764_v58, %v1264_v45 }
  0xcc   : > { %v416_v16 = vpop.xlane.xlu0 %415 }
  0xcd   : > { %v568_v20 = vsel %vm567_vm1, %v416_v16, 0.0 }
  0xd4   : > { %v418_v17 = vpop.xlane.xlu0 %417 }
  0xd5   : > { %v569_v18 = vsel %vm567_vm1, %v418_v17, 0.0  ;;  %v419_v19 = vpack.c.bf16 %v418_v17, %v416_v16 }
  0xd6   : > { %v570_v21 = vadd.f32 %v569_v18, %v568_v20 }
  0xd7   : > { %438 = vmatpush.bf16.msra.mxu1 %v419_v19 }
  0xd8   : > { %571 = vadd.xlane.f32.xlu1 %v570_v21 }
  0xda   : > { %761 = vmatmul.msk.bf16.vlgmr.msra.gmra.mxu1 %vm427_vm2, %v781_v22 }
  0xf4   : > { %v410_v47 = vpop.f32.mrf.mxu0 }
  0xfc   : > { %v412_v60 = vpop.f32.mrf.mxu0 }
 0x14b   : > { %v572_v31 = vpop.xlane.xlu1 %571 }
 0x14c   : > { %v573_v32 = vrot.slane %v572_v31, 4 }
 0x14e   : > { %v574_v34 = vadd.f32 %v573_v32, %v572_v31 }
 0x150   : > { %v575_v36 = vrot.slane %v574_v34, 2 }
 0x152   : > { %v576_v38 = vadd.f32 %v575_v36, %v574_v34 }
 0x154   : > { %v577_v40 = vrot.slane %v576_v38, 1 }
 0x156   : > { %v578_v44 = vadd.f32 %v577_v40, %v576_v38 }
 0x157   : > { %v440_v46 = vpop.f32.mrf.mxu1 }
 0x158   : > { %v446_v48 = vadd.f32 %v445_v42, %v440_v46  ;;  %786 = vpush %v578_v44 }
 0x15a   : > { %v448_v50 = vadd.f32 %v446_v48, %v410_v47 }
 0x15c   : > { %v467_v52 = vsub.f32 %v465_v39, %v448_v50  ;;  %v506_v53 = vsub.f32 %v448_v50, %v329_v4  ;;  %v472_v23 = vsub.f32 %v1264_v45, %v448_v50  ;;  %v558_v39 = vmax.f32 %v325_v29, 0.0 }
 0x15e   : > { %v470_v55 = vadd.f32 %v1264_v45, %v467_v52  ;;  %v1270_v56 = vsub.f32 %v510_v51, %v506_v53  ;;  %v518_v26 = vsub.f32 %v1264_v45, %v506_v53  ;;  %v556_v51 = vld [vmem:[#allocation3] sm:$0xff] }
 0x15f   : > { %v442_v57 = vpop.f32.mrf.mxu1 }
 0x160   : > { %867 = vrcp.f32 %v470_v55  ;;  %vm514_vm3 = vcmp.eq.f32.partialorder %v1270_v56, 0.0  ;;  %v447_v59 = vadd.f32 %v445_v42, %v442_v57  ;;  %v485_v10 = vand.u32 2147483648, %v470_v55 }
 0x161   : > { %v516_v61 = vsel %vm514_vm3, 1.0, %v1270_v56  ;;  %vm479_vm4 = vweird.f32 %v470_v55  ;;  %v483_v13 = vand.u32 2147483647, %v470_v55 }
 0x162   : > { %869 = vrcp.f32 %v516_v61  ;;  %v1276_v62 = vadd.f32 %v447_v59, %v412_v60  ;;  %v486_v15 = vor.u32 1.1754944e-38, %v485_v10  ;;  %v531_v16 = vand.u32 2147483648, %v516_v61 }
 0x163   : > { %vm525_vm8 = vweird.f32 %v516_v61  ;;  %v529_v18 = vand.u32 2147483647, %v516_v61  ;;  %vm484_vm10 = vcmp.eq.f32.partialorder %v483_v13, 8.507059e+37 }
 0x164   : > { %v468_v1 = vsub.f32 %v466_v54, %v1276_v62  ;;  %v1283_v3 = vsub.f32 %v1276_v62, %v330_v7  ;;  %v532_v24 = vor.u32 1.1754944e-38, %v531_v16 }
 0x165   : > { %vm530_vm12 = vcmp.eq.f32.partialorder %v529_v18, 8.507059e+37 }
 0x166   : > { %v868_v0 = vpop.eup %867  ;;  %v471_v5 = vadd.f32 %v1264_v45, %v468_v1  ;;  %v1287_v6 = vsub.f32 %v511_v63, %v1283_v3  ;;  %v519_v56 = vsub.f32 %v1264_v45, %v1283_v3  ;;  %v326_v63 = vld [vmem:[%s1230_s29 + $0x8] sm:$0xff] }
 0x167   : > { %v475_v4 = vmul.f32 %v868_v0, %v470_v55  ;;  %vm480_vm5 = vweird.f32 %v868_v0  ;;  %v473_v55 = vsub.f32 %v1264_v45, %v1276_v62 }
 0x168   : > { %v870_v8 = vpop.eup %869  ;;  %871 = vrcp.f32 %v471_v5  ;;  %vm515_vm6 = vcmp.eq.f32.partialorder %v1287_v6, 0.0  ;;  %vm481_vm7 = vmor %vm479_vm4, %vm480_vm5  ;;  %v500_v33 = vand.u32 2147483648, %v471_v5  ;;  %v498_v37 = vand.u32 2147483647, %v471_v5 }
 0x169   : > { %v476_v9 = vsub.f32 1.0, %v475_v4  ;;  %v521_v11 = vmul.f32 %v870_v8, %v516_v61  ;;  %v517_v7 = vsel %vm515_vm6, 1.0, %v1287_v6  ;;  %vm526_vm9 = vweird.f32 %v870_v8 }
 0x16a   : > { %873 = vrcp.f32 %v517_v7  ;;  %vm527_vm11 = vmor %vm525_vm8, %vm526_vm9  ;;  %vm494_vm14 = vweird.f32 %v471_v5  ;;  %v501_v43 = vor.u32 1.1754944e-38, %v500_v33  ;;  %v546_v44 = vand.u32 2147483648, %v517_v7 }
 0x16b   : > { %v477_v12 = vmul.f32 %v868_v0, %v476_v9  ;;  %v522_v2 = vsub.f32 1.0, %v521_v11  ;;  %v544_v48 = vand.u32 2147483647, %v517_v7  ;;  %vm499_vm1 = vcmp.eq.f32.partialorder %v498_v37, 8.507059e+37  ;;  %v557_v9 = vld [vmem:[#allocation3 + $0x8] sm:$0xff] }
 0x16c   : > { %vm540_vm2 = vweird.f32 %v517_v7  ;;  %v547_v57 = vor.u32 1.1754944e-38, %v546_v44  ;;  %vm582_vm5 = vcmask 0  }
 0x16d   : > { %v478_v14 = vadd.f32 %v868_v0, %v477_v12  ;;  %v523_v17 = vmul.f32 %v870_v8, %v522_v2  ;;  %v566_v12 = vld [vmem:[#allocation2] sm:$0x1] }
 0x16e   : > { %v872_v20 = vpop.eup %871 }
 0x16f   : > { %v482_v19 = vsel %vm481_vm7, %v868_v0, %v478_v14  ;;  %v524_v22 = vadd.f32 %v870_v8, %v523_v17  ;;  %v490_v25 = vmul.f32 %v872_v20, %v471_v5  ;;  %vm495_vm13 = vweird.f32 %v872_v20 }
 0x170   : > { %v487_v21 = vsel %vm484_vm10, %v486_v15, %v482_v19  ;;  %v874_v28 = vpop.eup %873  ;;  %vm496_vm15 = vmor %vm494_vm14, %vm495_vm13  ;;  %v559_v5 = vmax.f32 %v326_v63, 0.0 }
 0x171   : > { %v528_v27 = vsel %vm527_vm11, %v870_v8, %v524_v22  ;;  %v488_v30 = vmul.f32 %v487_v21, %v472_v23  ;;  %v491_v32 = vsub.f32 1.0, %v490_v25  ;;  %v536_v35 = vmul.f32 %v874_v28, %v517_v7 }
 0x172   : > { %v533_v31 = vsel %vm530_vm12, %v532_v24, %v528_v27  ;;  %vm541_vm0 = vweird.f32 %v874_v28 }
 0x173   : > { %v534_v34 = vmul.f32 %v533_v31, %v518_v26  ;;  %v492_v36 = vmul.f32 %v872_v20, %v491_v32  ;;  %v537_v40 = vsub.f32 1.0, %v536_v35  ;;  %v504_v41 = vsub.f32 1.0, %v488_v30  ;;  %vm542_vm4 = vmor %vm540_vm2, %vm541_vm0 }
 0x175   : > { %v550_v38 = vsub.f32 1.0, %v534_v34  ;;  %v493_v42 = vadd.f32 %v872_v20, %v492_v36  ;;  %v538_v47 = vmul.f32 %v874_v28, %v537_v40 }
 0x177   : > { %v552_v46 = vsel %vm514_vm3, 0.0, %v550_v38  ;;  %v497_v50 = vsel %vm496_vm15, %v872_v20, %v493_v42  ;;  %v539_v53 = vadd.f32 %v874_v28, %v538_v47  ;;  %vm545_vm3 = vcmp.eq.f32.partialorder %v544_v48, 8.507059e+37 }
 0x178   : > { %v554_v49 = vsub.f32 %v504_v41, %v552_v46  ;;  %v502_v52 = vsel %vm499_vm1, %v501_v43, %v497_v50 }
 0x179   : > { %v543_v58 = vsel %vm542_vm4, %v874_v28, %v539_v53  ;;  %v503_v60 = vmul.f32 %v502_v52, %v473_v55 }
 0x17a   : > { %v560_v54 = vmul.f32 %v558_v39, %v554_v49  ;;  %v548_v61 = vsel %vm545_vm3, %v547_v57, %v543_v58 }
 0x17b   : > { %v549_v0 = vmul.f32 %v548_v61, %v519_v56  ;;  %v505_v4 = vsub.f32 1.0, %v503_v60 }
 0x17c   : > { %v562_v59 = vadd.f32 %v560_v54, %v556_v51 }
 0x17d   : > { %v551_v1 = vsub.f32 1.0, %v549_v0 }
 0x17e   : > { %564 = vst [vmem:[#allocation3] sm:$0xff] %v562_v59 }
 0x17f   : > { %v553_v8 = vsel %vm515_vm6, 0.0, %v551_v1 }
 0x180   : > { %v555_v62 = vsub.f32 %v505_v4, %v553_v8 }
 0x182   : > { %v561_v10 = vmul.f32 %v559_v5, %v555_v62 }
 0x184   : > { %v563_v11 = vadd.f32 %v561_v10, %v557_v9 }
 0x186   : > { %565 = vst [vmem:[#allocation3 + $0x8] sm:$0xff] %v563_v11 }
 0x189   : > { %s787_s11 = spop %786  ;;  %587 = sbr.rel (%p765_p1) target bundleno = 581 (0x245), region = 64 }
 0x18a   : > { %v580_v45 = vstv %s787_s11 }
 0x18b   : > { %v581_v3 = vadd.f32 %v580_v45, %v566_v12 }
 0x18d   : > { %583 = vst.msk [vmem:[#allocation2] sm:$0x1] %vm582_vm5, %v581_v3 }
 0x18e   : > { %v588_v13 = vld [vmem:[#allocation3] sm:$0xff]  ;;  %v589_v2 = vld [vmem:[#allocation3 + $0x8] sm:$0xff] }
 0x18f   : > { %v590_v7 = vadd.f32 %v589_v2, %v588_v13 }
 0x191   : > { %591 = vadd.xlane.f32.xlu0 %v590_v7 }
 0x204   : > { %v592_v6 = vpop.xlane.xlu0 %591 }
 0x205   : > { %v593_v14 = vrot.slane %v592_v6, 4 }
 0x207   : > { %v594_v15 = vadd.f32 %v593_v14, %v592_v6 }
 0x209   : > { %v595_v16 = vrot.slane %v594_v15, 2 }
 0x20b   : > { %v596_v17 = vadd.f32 %v595_v16, %v594_v15 }
 0x20d   : > { %v597_v18 = vrot.slane %v596_v17, 1 }
 0x20f   : > { %v598_v19 = vadd.f32 %v597_v18, %v596_v17 }
 0x211   : > { %788 = vpush %v598_v19 }
 0x242   : > { %s789_s12 = spop %788 }
 0x243   : > { %v600_v20 = vstv %s789_s12 }
 0x244   : > { %602 = vst.msk [vmem:[#allocation13] sm:$0x1] %vm582_vm5, %v600_v20 }
 0x245 PF: > { %p825_p4 = scmp.eq.s32.totalorder %s1135_s0, 3  ;;  %s1082_s18 = smov [#allocation13]  }
 0x246   : > { %s609_s20 = sshll.u32 %s1082_s18, 4  ;;  %s611_s27 = sshll.u32 %s1330_s5, 4  ;;  %s610_s20 = int_to_ptr.vmem [resolvable:$true] %s609_s20  ;;  %s612_s27 = int_to_ptr.hbm [resolvable:$true] %s611_s27 }
 0x247   : > { %803 = dma.vmem_to_hbm [thread:$0]  (%p825_p4), %s610_s20, 16, %s612_s27, [#allocation7]  }
 0x248   : > { %1056 = dma.done.wait (%p825_p4), [#allocation7], 16  }
 0x249   : > { %1058 = vsyncadd (%p825_p4), [#allocation7], 4294967280 }
 0x24a PF: > { %p22_p5 = scmp.ge.s32.totalorder %s1169_s13, 6   ;;  %s1340_s20 = smov %s1065_s21 }
 0x24b   : > { %s1341_s21 = smov %s1069_s22  ;;  %s1342_s22 = smov %s1182_s17 }
 0x24c   : > { %s1343_s23 = smov %s1169_s13  ;;  %24 = sbr.rel (!%p22_p5) target bundleno = 10 (0xa), region = 106 }
 0x251   :  { %625 = vsyncpa [#allocation6], 1 }
 0x252   :  { %627 = vsyncpa [#allocation6 + $0x1], 1 }
 0x253   :  { %628 = vsyncpa [#allocation9], 1 }
 0x254   :  { %630 = vsyncpa [#allocation9 + $0x1], 1 }
 0x255   :  { %631 = vsyncpa [#allocation12], 1 }
 0x256   :  { %632 = vsyncpa [#allocation7], 1 }
 0x257   :  { %634 = vsyncpa [#allocation7 + $0x1], 1 }

</bundles_post_ra>
